<compile_context>
chip_gen: v7x
topology: tpu7x:2x2x1
jax: 0.10.0
libtpu: 0.0.40
codegen_flags: <defaults>
</compile_context>

<pallas_src>
import jax
import jax.numpy as jnp
from jax.experimental import pallas as pl
from jax.experimental.pallas import tpu as pltpu

F_IN = 784
H1 = 128
H2 = 64
OUT = 10
OUT_PAD = 128        # lane-dense output width (unmasked stores)
NEG_BIG = -1e30      # padded b3 value; exp() underflows to 0 in log_softmax


def mlp_kernel(x_ref, w1_ref, b1_ref, w2_ref, b2_ref, w3_ref, b3_ref, o_ref):
    # In-kernel cast of the f32 x tile to bf16 (MXU input type); x never gets a
    # separate pad/cast pass over HBM.
    x = x_ref[...].astype(jnp.bfloat16)

    # Layer 1: (TB, 784)bf16 @ (784, 128)bf16 -> f32 acc, +bias, ReLU
    h1 = jnp.dot(x, w1_ref[...], preferred_element_type=jnp.float32)
    h1 = jnp.maximum(h1 + b1_ref[...], 0.0)

    # Layer 2: (TB, 128) @ (128, 64) -> f32 acc, +bias, ReLU
    h2 = jnp.dot(h1.astype(jnp.bfloat16), w2_ref[...],
                 preferred_element_type=jnp.float32)
    h2 = jnp.maximum(h2 + b2_ref[...], 0.0)

    # Layer 3 (padded to 128 cols): (TB, 64) @ (64, 128) -> f32 acc, +bias
    logits = jnp.dot(h2.astype(jnp.bfloat16), w3_ref[...],
                     preferred_element_type=jnp.float32)
    logits = logits + b3_ref[...]   # padded cols get -1e30 -> exp() == 0

    # Numerically stable log_softmax over the (padded) feature axis, in f32.
    m = jnp.max(logits, axis=-1, keepdims=True)
    shifted = logits - m
    lse = jnp.log(jnp.sum(jnp.exp(shifted), axis=-1, keepdims=True))
    o_ref[...] = (shifted - lse).astype(o_ref.dtype)


def _round_up(n, m):
    return ((n + m - 1) // m) * m


def _choose_batch_tile(B, block_b):
    """Batch tile: multiple of 8 sublanes, capped at block_b, and small enough
    that the grid has >= 2 steps when B >= 16 (so v7x megacore shards)."""
    tb = min(block_b, _round_up(B, 8))
    if B >= 16:
        tb = min(tb, _round_up(-(-B // 2), 8))
    return max(tb, 8)


def modelo_forward(x, params, *, block_b=1024):
    """x: (B, 784) float32. params: dict (see init_params). Returns (B, 10) bf16."""
    B = x.shape[0]
    TB = _choose_batch_tile(B, block_b)
    grid = (pl.cdiv(B, TB),)   # partial last block is fine: OOB rows are masked

    # --- wrapper-side prep (weights only; tiny & one-time cost) --------------
    w1 = params["w1"].astype(jnp.bfloat16)                     # (784, 128)
    b1 = params["b1"].astype(jnp.float32)                      # (1, 128)
    w2 = params["w2"].astype(jnp.bfloat16)                     # (128, 64)
    b2 = params["b2"].astype(jnp.float32)                      # (1, 64)
    w3 = jnp.pad(params["w3"].astype(jnp.bfloat16),
                 ((0, 0), (0, OUT_PAD - OUT)))                 # (64, 128)
    b3 = jnp.pad(params["b3"].astype(jnp.float32),
                 ((0, 0), (0, OUT_PAD - OUT)),
                 constant_values=NEG_BIG)                      # (1, 128)

    out = pl.pallas_call(
        mlp_kernel,
        out_shape=jax.ShapeDtypeStruct((B, OUT_PAD), jnp.bfloat16),
        grid=grid,
        in_specs=[
            # x: batch-tiled, unpadded f32; last dim == full array dim (784).
            pl.BlockSpec((TB, F_IN), lambda i: (i, 0)),
            # weights / biases stay resident (constant index_map).
            pl.BlockSpec((F_IN, H1), lambda i: (0, 0)),
            pl.BlockSpec((1, H1),     lambda i: (0, 0)),
            pl.BlockSpec((H1, H2),    lambda i: (0, 0)),
            pl.BlockSpec((1, H2),     lambda i: (0, 0)),
            pl.BlockSpec((H2, OUT_PAD), lambda i: (0, 0)),
            pl.BlockSpec((1, OUT_PAD),  lambda i: (0, 0)),
        ],
        out_specs=pl.BlockSpec((TB, OUT_PAD), lambda i: (i, 0)),
        compiler_params=pltpu.CompilerParams(
            dimension_semantics=("parallel",),          # megacore sharding on v7x
            vmem_limit_bytes=48 * 1024 * 1024,          # headroom if block_b is raised
        ),
    )(x, w1, b1, w2, b2, w3, b3)

    return out[:, :OUT]


def init_params():
    """Deterministic parameter init (Kaiming-uniform-ish like nn.Linear default).

    Weights are stored as (in_features, out_features) — the transpose of
    PyTorch's nn.Linear.weight — so the kernel computes x @ W + b.
    """
    key = jax.random.PRNGKey(42)
    keys = jax.random.split(key, 6)

    def linear_init(kw, kb, fan_in, fan_out):
        bound = 1.0 / jnp.sqrt(fan_in)
        w = jax.random.uniform(kw, (fan_in, fan_out), jnp.float32, -bound, bound)
        b = jax.random.uniform(kb, (1, fan_out), jnp.float32, -bound, bound)
        return w, b

    w1, b1 = linear_init(keys[0], keys[1], F_IN, H1)
    w2, b2 = linear_init(keys[2], keys[3], H1, H2)
    w3, b3 = linear_init(keys[4], keys[5], H2, OUT)
    return {"w1": w1, "b1": b1, "w2": w2, "b2": b2, "w3": w3, "b3": b3}


def modelo_reference(x, params):
    """Pure-JAX f32 reference (matches the PyTorch forward)."""
    h1 = jnp.maximum(x @ params["w1"] + params["b1"], 0.0)
    h2 = jnp.maximum(h1 @ params["w2"] + params["b2"], 0.0)
    logits = h2 @ params["w3"] + params["b3"]
    return jax.nn.log_softmax(logits, axis=1)


if __name__ == "__main__":
    params = init_params()

    # Small batch of "MNIST-like" flattened inputs: (B, 784).
    B = 8
    x = jax.random.normal(jax.random.PRNGKey(0), (B, F_IN), dtype=jnp.float32)

    out = modelo_forward(x, params)
    out = jax.block_until_ready(out)

    assert out.shape == (B, OUT)
    out_f32 = out.astype(jnp.float32)

    # Sanity 1: log_softmax rows exp-sum to ~1 (bf16 output rounding -> loose tol).
    row_sums = jnp.sum(jnp.exp(out_f32), axis=1)
    assert bool(jnp.all(jnp.abs(row_sums - 1.0) < 2e-2)), row_sums

    # Sanity 2: close to the f32 reference (bf16 matmul inputs + bf16 output).
    ref = modelo_reference(x, params)
    max_err = float(jnp.max(jnp.abs(out_f32 - ref)))
    assert max_err < 0.15, f"max abs err vs reference: {max_err}"

    print("KERNEL_OK")
</pallas_src>

<mosaic_0001>
module attributes {stable_mosaic.version = 11 : i64} {
  func.func @mlp_kernel(%arg0: i32, %arg1: memref<8x784xf32, #tpu.memory_space<vmem>>, %arg2: memref<784x128xbf16, #tpu.memory_space<vmem>>, %arg3: memref<1x128xf32, #tpu.memory_space<vmem>>, %arg4: memref<128x64xbf16, #tpu.memory_space<vmem>>, %arg5: memref<1x64xf32, #tpu.memory_space<vmem>>, %arg6: memref<64x128xbf16, #tpu.memory_space<vmem>>, %arg7: memref<1x128xf32, #tpu.memory_space<vmem>>, %arg8: memref<8x128xbf16, #tpu.memory_space<vmem>>) attributes {dimension_semantics = [#tpu.dimension_semantics<parallel>], iteration_bounds = array<i64: 1>, scalar_prefetch = 0 : i64, scratch_operands = 0 : i64, tpu.core_type = #tpu.core_type<tc>, window_params = [{transform_indices = @transform_0, window_bounds = array<i64: 8, 784>}, {pipeline_mode = #tpu.pipeline_mode<synchronous>, transform_indices = @transform_1, window_bounds = array<i64: 784, 128>}, {pipeline_mode = #tpu.pipeline_mode<synchronous>, transform_indices = @transform_2, window_bounds = array<i64: 1, 128>}, {pipeline_mode = #tpu.pipeline_mode<synchronous>, transform_indices = @transform_3, window_bounds = array<i64: 128, 64>}, {pipeline_mode = #tpu.pipeline_mode<synchronous>, transform_indices = @transform_4, window_bounds = array<i64: 1, 64>}, {pipeline_mode = #tpu.pipeline_mode<synchronous>, transform_indices = @transform_5, window_bounds = array<i64: 64, 128>}, {pipeline_mode = #tpu.pipeline_mode<synchronous>, transform_indices = @transform_6, window_bounds = array<i64: 1, 128>}, {transform_indices = @transform_7, window_bounds = array<i64: 8, 128>}]} {
    %c0 = arith.constant 0 : index
    %c0_0 = arith.constant 0 : index
    %0 = vector.load %arg1[%c0, %c0_0] : memref<8x784xf32, #tpu.memory_space<vmem>>, vector<8x784xf32>
    %1 = arith.truncf %0 : vector<8x784xf32> to vector<8x784xbf16>
    %c0_1 = arith.constant 0 : index
    %c0_2 = arith.constant 0 : index
    %2 = vector.load %arg2[%c0_1, %c0_2] : memref<784x128xbf16, #tpu.memory_space<vmem>>, vector<784x128xbf16>
    %cst = arith.constant dense<0.000000e+00> : vector<8x128xf32>
    %3 = tpu.matmul %1, %2, %cst {dimension_numbers = #tpu.dot_dimension_numbers<[1], [0], [0], [1], [0, 0, 1, 1], [], []>} : vector<8x784xbf16>, vector<784x128xbf16>, vector<8x128xf32> -> vector<8x128xf32>
    %c0_3 = arith.constant 0 : index
    %c0_4 = arith.constant 0 : index
    %4 = vector.load %arg3[%c0_3, %c0_4] : memref<1x128xf32, #tpu.memory_space<vmem>>, vector<1x128xf32>
    %5 = vector.broadcast %4 : vector<1x128xf32> to vector<8x128xf32>
    %6 = arith.addf %3, %5 : vector<8x128xf32>
    %cst_5 = arith.constant 0.000000e+00 : f32
    %7 = vector.broadcast %cst_5 : f32 to vector<8x128xf32>
    %8 = arith.maximumf %6, %7 : vector<8x128xf32>
    %9 = arith.truncf %8 : vector<8x128xf32> to vector<8x128xbf16>
    %c0_6 = arith.constant 0 : index
    %c0_7 = arith.constant 0 : index
    %10 = vector.load %arg4[%c0_6, %c0_7] : memref<128x64xbf16, #tpu.memory_space<vmem>>, vector<128x64xbf16>
    %cst_8 = arith.constant dense<0.000000e+00> : vector<8x64xf32>
    %11 = tpu.matmul %9, %10, %cst_8 {dimension_numbers = #tpu.dot_dimension_numbers<[1], [0], [0], [1], [0, 0, 1, 1], [], []>} : vector<8x128xbf16>, vector<128x64xbf16>, vector<8x64xf32> -> vector<8x64xf32>
    %c0_9 = arith.constant 0 : index
    %c0_10 = arith.constant 0 : index
    %12 = vector.load %arg5[%c0_9, %c0_10] : memref<1x64xf32, #tpu.memory_space<vmem>>, vector<1x64xf32>
    %13 = vector.broadcast %12 : vector<1x64xf32> to vector<8x64xf32>
    %14 = arith.addf %11, %13 : vector<8x64xf32>
    %cst_11 = arith.constant 0.000000e+00 : f32
    %15 = vector.broadcast %cst_11 : f32 to vector<8x64xf32>
    %16 = arith.maximumf %14, %15 : vector<8x64xf32>
    %17 = arith.truncf %16 : vector<8x64xf32> to vector<8x64xbf16>
    %c0_12 = arith.constant 0 : index
    %c0_13 = arith.constant 0 : index
    %18 = vector.load %arg6[%c0_12, %c0_13] : memref<64x128xbf16, #tpu.memory_space<vmem>>, vector<64x128xbf16>
    %cst_14 = arith.constant dense<0.000000e+00> : vector<8x128xf32>
    %19 = tpu.matmul %17, %18, %cst_14 {dimension_numbers = #tpu.dot_dimension_numbers<[1], [0], [0], [1], [0, 0, 1, 1], [], []>} : vector<8x64xbf16>, vector<64x128xbf16>, vector<8x128xf32> -> vector<8x128xf32>
    %c0_15 = arith.constant 0 : index
    %c0_16 = arith.constant 0 : index
    %20 = vector.load %arg7[%c0_15, %c0_16] : memref<1x128xf32, #tpu.memory_space<vmem>>, vector<1x128xf32>
    %21 = vector.broadcast %20 : vector<1x128xf32> to vector<8x128xf32>
    %22 = arith.addf %19, %21 : vector<8x128xf32>
    %cst_17 = arith.constant dense<0xFF800000> : vector<8xf32>
    %23 = vector.multi_reduction <maximumf>, %22, %cst_17 [1] : vector<8x128xf32> to vector<8xf32>
    %24 = vector.shape_cast %23 : vector<8xf32> to vector<8x1xf32>
    %25 = vector.broadcast %24 : vector<8x1xf32> to vector<8x128xf32>
    %26 = arith.subf %22, %25 : vector<8x128xf32>
    %27 = math.exp %26 : vector<8x128xf32>
    %cst_18 = arith.constant dense<0.000000e+00> : vector<8xf32>
    %28 = vector.multi_reduction <add>, %27, %cst_18 [1] : vector<8x128xf32> to vector<8xf32>
    %29 = vector.shape_cast %28 : vector<8xf32> to vector<8x1xf32>
    %30 = math.log %29 : vector<8x1xf32>
    %31 = vector.broadcast %30 : vector<8x1xf32> to vector<8x128xf32>
    %32 = arith.subf %26, %31 : vector<8x128xf32>
    %33 = arith.truncf %32 : vector<8x128xf32> to vector<8x128xbf16>
    %c0_19 = arith.constant 0 : index
    %c0_20 = arith.constant 0 : index
    %34 = vector.load %arg8[%c0_19, %c0_20] : memref<8x128xbf16, #tpu.memory_space<vmem>>, vector<8x128xbf16>
    tpu.vector_store %arg8[%c0_19, %c0_20], %33 {strides = array<i32>} : memref<8x128xbf16, #tpu.memory_space<vmem>>, vector<8x128xbf16>,
    return
  }
  func.func @transform_0(%arg0: i32) -> (i32, i32) {
    %c0_i32 = arith.constant 0 : i32
    %c0_i32_0 = arith.constant 0 : i32
    return %arg0, %c0_i32 : i32, i32
  }
  func.func @transform_1(%arg0: i32) -> (i32, i32) {
    %c0_i32 = arith.constant 0 : i32
    %c0_i32_0 = arith.constant 0 : i32
    %c0_i32_1 = arith.constant 0 : i32
    return %c0_i32, %c0_i32_0 : i32, i32
  }
  func.func @transform_2(%arg0: i32) -> (i32, i32) {
    %c0_i32 = arith.constant 0 : i32
    %c0_i32_0 = arith.constant 0 : i32
    %c0_i32_1 = arith.constant 0 : i32
    return %c0_i32, %c0_i32_0 : i32, i32
  }
  func.func @transform_3(%arg0: i32) -> (i32, i32) {
    %c0_i32 = arith.constant 0 : i32
    %c0_i32_0 = arith.constant 0 : i32
    %c0_i32_1 = arith.constant 0 : i32
    return %c0_i32, %c0_i32_0 : i32, i32
  }
  func.func @transform_4(%arg0: i32) -> (i32, i32) {
    %c0_i32 = arith.constant 0 : i32
    %c0_i32_0 = arith.constant 0 : i32
    %c0_i32_1 = arith.constant 0 : i32
    return %c0_i32, %c0_i32_0 : i32, i32
  }
  func.func @transform_5(%arg0: i32) -> (i32, i32) {
    %c0_i32 = arith.constant 0 : i32
    %c0_i32_0 = arith.constant 0 : i32
    %c0_i32_1 = arith.constant 0 : i32
    return %c0_i32, %c0_i32_0 : i32, i32
  }
  func.func @transform_6(%arg0: i32) -> (i32, i32) {
    %c0_i32 = arith.constant 0 : i32
    %c0_i32_0 = arith.constant 0 : i32
    %c0_i32_1 = arith.constant 0 : i32
    return %c0_i32, %c0_i32_0 : i32, i32
  }
  func.func @transform_7(%arg0: i32) -> (i32, i32) {
    %c0_i32 = arith.constant 0 : i32
    %c0_i32_0 = arith.constant 0 : i32
    return %arg0, %c0_i32 : i32, i32
  }
}

</mosaic_0001>

<bundles_post_ra>
// kernel: tpu_custom_call.1
= control target key start
LH: loop header
LB: loop body
LE: loop exit
PB: predicated region body
PF: predicated region fallthrough
CT: control target
= control target key end

     0   :  { %12 = vsyncpa [#allocation3], 0  ;;  %s1304_s0 = inlined_call_operand.vmem [shape: f32[8,784], index: 0, kind: input, shape index: {}]   ;;  %s1305_s1 = inlined_call_operand.hbm [shape: bf16[784,128], index: 1, kind: input, shape index: {}]   ;;  %s1306_s2 = inlined_call_operand.vmem [shape: f32[1,128], index: 2, kind: input, shape index: {}]   ;;  %s1307_s3 = inlined_call_operand.vmem [shape: bf16[128,64], index: 3, kind: input, shape index: {}]   ;;  %s1308_s4 = inlined_call_operand.vmem [shape: f32[1,64], index: 4, kind: input, shape index: {}]   ;;  %s1309_s5 = inlined_call_operand.vmem [shape: bf16[64,128], index: 5, kind: input, shape index: {}]   ;;  %s1310_s6 = inlined_call_operand.vmem [shape: f32[1,128], index: 6, kind: input, shape index: {}]   ;;  %s1311_s7 = inlined_call_operand.hbm [shape: bf16[8,128], index: 7, kind: output, shape index: {}]  }
   0x1   :  { %13 = vsyncpa [#allocation4], 0  ;;  %s1149_s24 = smov [#allocation2]   ;;  %s1101_s28 = scalar_lea.hbm %s1305_s1, 6272 }
   0x2   :  { %s21_s25 = sshll.u32 %s1149_s24, 4  ;;  %p1102_p0 = scmp.ne.s32.totalorder %s1305_s1, %s1101_s28  ;;  %s22_s25 = int_to_ptr.vmem [resolvable:$true] %s21_s25 }
   0x3   :  { %p1105_p1 = scmp.lt.u32.totalorder %s1101_s28, %s1305_s1 }
   0x5   :  { %p1107_p2 = pnand %p1105_p1, %p1102_p0 }
   0x7   :  { %1110 = shalt.err (!%p1107_p2)
}
   0x8   :  { %s1111_s10 = scalar_lea.vmem %s22_s25, 6272  ;;  %p1116_p4 = scmp.lt.s32.totalorder %s22_s25, %s22_s25 }
   0x9   :  { %p1112_p3 = scmp.ne.s32.totalorder %s22_s25, %s1111_s10  ;;  %p1117_p5 = scmp.lt.s32.totalorder %s1111_s10, %s1111_s10 }
   0xb   :  { %p1118_p6 = por %p1117_p5, %p1116_p4 }
   0xd   :  { %p1119_p7 = pnand %p1118_p6, %p1112_p3 }
   0xf   :  { %1122 = shalt.err (!%p1119_p7)
}
  0x10   :  { %s1150_s11 = smov 64   ;;  %s1151_s12 = smov 4  }
  0x11   :  { %27 = dma.hbm_to_vmem [thread:$0]  %s1305_s1, 6272, %s22_s25, [#allocation3], %s1150_s11, %s1150_s11, %s1151_s12  }
  0x12   :  { %1145 = dma.done.wait [#allocation3], 6272  }
  0x13   :  { %1146 = vsyncadd [#allocation3], 4294961024  ;;  %v1036_v0 = vld [vmem:[#allocation2 + $0x40] sm:$0xff]   ;;  %v1040_v4 = vld [vmem:[#allocation2 + $0x48] sm:$0xff]   ;;  %v1152_v44 = vmov 0.0   ;;  %vm1153_vm0 = vmmov 0  }
  0x14   :  { %v1037_v1 = vld [vmem:[#allocation2] sm:$0xff]   ;;  %910 = vmatprep.subr.bf16.mxu0 %v1036_v0  ;;  %v1041_v5 = vld [vmem:[#allocation2 + $0x8] sm:$0xff]   ;;  %v1044_v8 = vld [vmem:[#allocation2 + $0x50] sm:$0xff]   ;;  %vm455_vm1 = vcmask 130048   ;;  %vm773_vm2 = vcmask 523264  }
  0x15   :  { %v1038_v2 = vld [vmem:[#allocation2 + $0xc0] sm:$0xff]   ;;  %911 = vmatpush3.bf16.msra.mxu0 %v1037_v1  ;;  %v1042_v6 = vld [vmem:[#allocation2 + $0xc8] sm:$0xff]   ;;  %v1045_v9 = vld [vmem:[#allocation2 + $0x10] sm:$0xff]  }
  0x16   :  { %v1039_v3 = vld [vmem:[#allocation2 + $0x80] sm:$0xff]   ;;  %932 = vmatprep.subr.bf16.mxu1 %v1038_v2  ;;  %912 = vmatprep.subr.bf16.mxu0 %v1040_v4  ;;  %v1043_v7 = vld [vmem:[#allocation2 + $0x88] sm:$0xff]   ;;  %v1046_v10 = vld [vmem:[#allocation2 + $0xd0] sm:$0xff]  }
  0x17   :  { %933 = vmatpush3.bf16.msra.mxu1 %v1039_v3  ;;  %v1047_v11 = vld [vmem:[#allocation2 + $0x90] sm:$0xff]   ;;  %v1048_v12 = vld [vmem:[#allocation2 + $0x58] sm:$0xff]   ;;  %v1052_v16 = vld [vmem:[#allocation2 + $0x60] sm:$0xff]  }
  0x18   :  { %934 = vmatprep.subr.bf16.mxu1 %v1042_v6  ;;  %v1049_v13 = vld [vmem:[#allocation2 + $0x18] sm:$0xff]   ;;  %v1053_v17 = vld [vmem:[#allocation2 + $0x20] sm:$0xff]   ;;  %v1056_v20 = vld [vmem:[#allocation2 + $0x68] sm:$0xff]  }
  0x19   :  { %913 = vmatpush3.bf16.msra.mxu0 %v1041_v5  ;;  %v1050_v14 = vld [vmem:[#allocation2 + $0xd8] sm:$0xff]   ;;  %v1054_v18 = vld [vmem:[#allocation2 + $0xe0] sm:$0xff]   ;;  %v1057_v21 = vld [vmem:[#allocation2 + $0x28] sm:$0xff]  }
  0x1a   :  { %914 = vmatprep.subr.bf16.mxu0 %v1044_v8  ;;  %v1051_v15 = vld [vmem:[#allocation2 + $0x98] sm:$0xff]   ;;  %v1055_v19 = vld [vmem:[#allocation2 + $0xa0] sm:$0xff]   ;;  %v1058_v22 = vld [vmem:[#allocation2 + $0xe8] sm:$0xff]  }
  0x1b   :  { %935 = vmatpush3.bf16.msra.mxu1 %v1043_v7  ;;  %v1059_v23 = vld [vmem:[#allocation2 + $0xa8] sm:$0xff]   ;;  %v1060_v24 = vld [vmem:[#allocation2 + $0x70] sm:$0xff]   ;;  %v1064_v28 = vld [vmem:[#allocation2 + $0x78] sm:$0xff]  }
  0x1c   :  { %936 = vmatprep.subr.bf16.mxu1 %v1046_v10  ;;  %v1061_v25 = vld [vmem:[#allocation2 + $0x30] sm:$0xff]   ;;  %v1065_v29 = vld [vmem:[#allocation2 + $0x38] sm:$0xff]   ;;  %v43_v31 = vld [vmem:[%s1304_s0 + $0x8] sm:$0xff] }
  0x1d   :  { %915 = vmatpush3.bf16.msra.mxu0 %v1045_v9  ;;  %v1062_v26 = vld [vmem:[#allocation2 + $0xf0] sm:$0xff]   ;;  %v1066_v30 = vld [vmem:[#allocation2 + $0xf8] sm:$0xff]   ;;  %v50_v32 = vpack.c.bf16 %v43_v31, %v43_v31  ;;  %v42_v34 = vld [vmem:[%s1304_s0] sm:$0xff] }
  0x1e   :  { %916 = vmatprep.subr.bf16.mxu0 %v1048_v12  ;;  %v1063_v27 = vld [vmem:[#allocation2 + $0xb0] sm:$0xff]   ;;  %v1067_v33 = vld [vmem:[#allocation2 + $0xb8] sm:$0xff]   ;;  %v49_v35 = vpack.c.bf16 %v42_v34, %v42_v34  ;;  %v1068_v36 = vld [vmem:[#allocation2 + $0x140] sm:$0xff]  }
  0x1f   :  { %937 = vmatpush3.bf16.msra.mxu1 %v1047_v11  ;;  %v45_v37 = vld [vmem:[%s1304_s0 + $0x18] sm:$0xff]  ;;  %491 = vmatprep.mubr.bf16.mxu0 %v50_v32  ;;  %v1069_v39 = vld [vmem:[#allocation2 + $0x100] sm:$0xff]   ;;  %v44_v40 = vld [vmem:[%s1304_s0 + $0x10] sm:$0xff] }
  0x20   :  { %938 = vmatprep.subr.bf16.mxu1 %v1050_v14  ;;  %v52_v38 = vpack.c.bf16 %v45_v37, %v45_v37  ;;  %v51_v41 = vpack.c.bf16 %v44_v40, %v44_v40  ;;  %v1070_v42 = vld [vmem:[#allocation2 + $0x148] sm:$0xff]   ;;  %v1072_v45 = vld [vmem:[#allocation2 + $0x150] sm:$0xff]   ;;  %v1074_v47 = vld [vmem:[#allocation2 + $0x158] sm:$0xff]  }
  0x21   :  { %917 = vmatpush3.bf16.msra.mxu0 %v1049_v13  ;;  %v1071_v43 = vld [vmem:[#allocation2 + $0x108] sm:$0xff]   ;;  %v1073_v46 = vld [vmem:[#allocation2 + $0x110] sm:$0xff]   ;;  %v1075_v48 = vld [vmem:[#allocation2 + $0x118] sm:$0xff]  }
  0x22   :  { %918 = vmatprep.subr.bf16.mxu0 %v1052_v16  ;;  %531 = vmatprep.mubr.bf16.mxu1 %v52_v38  ;;  %v1076_v49 = vld [vmem:[#allocation2 + $0x160] sm:$0xff]   ;;  %v1078_v51 = vld [vmem:[#allocation2 + $0x168] sm:$0xff]   ;;  %v1080_v55 = vld [vmem:[#allocation2 + $0x170] sm:$0xff]  }
  0x23   :  { %939 = vmatpush3.bf16.msra.mxu1 %v1051_v15  ;;  %v1077_v50 = vld [vmem:[#allocation2 + $0x120] sm:$0xff]   ;;  %v1079_v52 = vld [vmem:[#allocation2 + $0x128] sm:$0xff]   ;;  %v48_v57 = vld [vmem:[%s1304_s0 + $0x30] sm:$0xff] }
  0x24   :  { %940 = vmatprep.subr.bf16.mxu1 %v1054_v18  ;;  %v1084_v53 = vld [vmem:[#allocation2 + $0x180] sm:$0xff]   ;;  %v47_v54 = vld [vmem:[%s1304_s0 + $0x28] sm:$0xff]  ;;  %v55_v58 = vpack.c.bf16 %v48_v57, %v48_v57  ;;  %v1081_v59 = vld [vmem:[#allocation2 + $0x130] sm:$0xff]  }
  0x25   :  { %919 = vmatpush3.bf16.msra.mxu0 %v1053_v17  ;;  %v54_v56 = vpack.c.bf16 %v47_v54, %v47_v54  ;;  %v1082_v60 = vld [vmem:[#allocation2 + $0x178] sm:$0xff]   ;;  %v46_v62 = vld [vmem:[%s1304_s0 + $0x20] sm:$0xff]  ;;  %v1086_v1 = vld [vmem:[%s1307_s3 + $0x8] sm:$0xff]  }
  0x26   :  { %920 = vmatprep.subr.bf16.mxu0 %v1056_v20  ;;  %v1083_v61 = vld [vmem:[#allocation2 + $0x138] sm:$0xff]   ;;  %v53_v63 = vpack.c.bf16 %v46_v62, %v46_v62  ;;  %v1085_v0 = vld [vmem:[%s1307_s3] sm:$0xff]   ;;  %v1087_v2 = vld [vmem:[%s1307_s3 + $0x10] sm:$0xff]  }
  0x27   :  { %941 = vmatpush3.bf16.msra.mxu1 %v1055_v19  ;;  %v1088_v3 = vld [vmem:[%s1307_s3 + $0x18] sm:$0xff]   ;;  %v1089_v4 = vld [vmem:[%s1307_s3 + $0x20] sm:$0xff]   ;;  %v1090_v5 = vld [vmem:[%s1307_s3 + $0x28] sm:$0xff]  }
  0x28   :  { %942 = vmatprep.subr.bf16.mxu1 %v1058_v22  ;;  %v1091_v6 = vld [vmem:[%s1307_s3 + $0x30] sm:$0xff]   ;;  %v1092_v7 = vld [vmem:[%s1307_s3 + $0x38] sm:$0xff]   ;;  %v1093_v8 = vld [vmem:[%s1309_s5] sm:$0xff]  }
  0x29   :  { %921 = vmatpush3.bf16.msra.mxu0 %v1057_v21  ;;  %v1094_v9 = vld [vmem:[%s1309_s5 + $0x8] sm:$0xff]   ;;  %v844_v11 = vld [vmem:[%s1306_s2] ss:$0 sm:$0xff]  ;;  %v1096_v37 = vld [vmem:[%s1309_s5 + $0x18] sm:$0xff]  }
  0x2a   :  { %922 = vmatprep.subr.bf16.mxu0 %v1060_v24  ;;  %v895_v38 = vld [vmem:[%s1308_s4] ss:$0 sm:$0xff]  ;;  %s1154_s4 = smov [#allocation5]  }
  0x2b   :  { %943 = vmatpush3.bf16.msra.mxu1 %v1059_v23 }
  0x2c   :  { %944 = vmatprep.subr.bf16.mxu1 %v1062_v26 }
  0x2d   :  { %923 = vmatpush3.bf16.msra.mxu0 %v1061_v25 }
  0x2e   :  { %924 = vmatprep.subr.bf16.mxu0 %v1064_v28 }
  0x2f   :  { %945 = vmatpush3.bf16.msra.mxu1 %v1063_v27 }
  0x30   :  { %946 = vmatprep.subr.bf16.mxu1 %v1066_v30 }
  0x31   :  { %925 = vmatpush3.bf16.msra.mxu0 %v1065_v29 }
  0x32   :  { %954 = vmatprep.subr.bf16.mxu0 %v1068_v36  ;;  %v1095_v36 = vld [vmem:[%s1309_s5 + $0x10] sm:$0xff]   ;;  %s835_s5 = sshll.u32 %s1154_s4, 4  ;;  %s836_s5 = int_to_ptr.vmem [resolvable:$true] %s835_s5 }
  0x33   :  { %947 = vmatpush3.bf16.msra.mxu1 %v1067_v33  ;;  %p1128_p9 = scmp.lt.s32.totalorder %s836_s5, %s836_s5 }
  0x34   :  { %492 = vmatmul.mubr.bf16.vlgmr.msra.gmra.mrb[0].mxu0 %v49_v35  ;;  %992 = vmatprep.subr.bf16.mxu1 %v1152_v44 }
  0x35   :  { %955 = vmatpush3.bf16.msra.mxu0 %v1069_v39  ;;  %571 = vmatprep.mubr.bf16.mxu0 %v54_v56 }
  0x36   :  { %532 = vmatmul.mubr.bf16.vlgmr.msra.gmra.mrb[0].mxu1 %v51_v41  ;;  %956 = vmatprep.subr.bf16.mxu0 %v1070_v42 }
  0x37   :  { %994 = vmatprep.mubr.msk.bf16.mxu1 %vm1153_vm0, %v1152_v44  ;;  %993 = vmatpush3.bf16.msra.mxu1 %v1084_v53 }
  0x38   :  { %998 = vmatprep.subr.bf16.mxu1 %v1152_v44 }
  0x39   :  { %957 = vmatpush3.bf16.msra.mxu0 %v1071_v43 }
  0x3a   :  { %958 = vmatprep.subr.bf16.mxu0 %v1072_v45 }
  0x3d   :  { %959 = vmatpush3.bf16.msra.mxu0 %v1073_v46 }
  0x3e   :  { %960 = vmatprep.subr.bf16.mxu0 %v1074_v47  ;;  %995 = vmatmul.mubr.msk.bf16.vlgmr.msra.gmra.mrb[4].mxu1 %vm455_vm1, %v55_v58 }
  0x3f   :  { %1014 = vmatprep.mubr.msk.bf16.mxu1 %vm1153_vm0, %v1152_v44  ;;  %999 = vmatpush3.bf16.msra.mxu1 %v1085_v0 }
  0x40   :  { %1000 = vmatprep.subr.bf16.mxu1 %v1152_v44 }
  0x41   :  { %961 = vmatpush3.bf16.msra.mxu0 %v1075_v48 }
  0x42   :  { %962 = vmatprep.subr.bf16.mxu0 %v1076_v49 }
  0x43   :  { %1001 = vmatpush3.bf16.msra.mxu1 %v1086_v1 }
  0x44   :  { %1002 = vmatprep.subr.bf16.mxu1 %v1152_v44 }
  0x45   :  { %963 = vmatpush3.bf16.msra.mxu0 %v1077_v50 }
  0x46   :  { %964 = vmatprep.subr.bf16.mxu0 %v1078_v51 }
  0x47   :  { %1003 = vmatpush3.bf16.msra.mxu1 %v1087_v2 }
  0x48   :  { %1004 = vmatprep.subr.bf16.mxu1 %v1152_v44 }
  0x49   :  { %965 = vmatpush3.bf16.msra.mxu0 %v1079_v52 }
  0x4a   :  { %966 = vmatprep.subr.bf16.mxu0 %v1080_v55 }
  0x4b   :  { %1005 = vmatpush3.bf16.msra.mxu1 %v1088_v3 }
  0x4c   :  { %1006 = vmatprep.subr.bf16.mxu1 %v1152_v44 }
  0x4d   :  { %967 = vmatpush3.bf16.msra.mxu0 %v1081_v59 }
  0x4e   :  { %968 = vmatprep.subr.bf16.mxu0 %v1082_v60 }
  0x4f   :  { %1007 = vmatpush3.bf16.msra.mxu1 %v1089_v4 }
  0x50   :  { %1008 = vmatprep.subr.bf16.mxu1 %v1152_v44 }
  0x51   :  { %969 = vmatpush3.bf16.msra.mxu0 %v1083_v61 }
  0x52   :  { %1018 = vmatprep.subr.bf16.mxu0 %v1152_v44 }
  0x53   :  { %1009 = vmatpush3.bf16.msra.mxu1 %v1090_v5 }
  0x54   :  { %572 = vmatmul.mubr.bf16.vlgmr.msra.gmra.mrb[4].mxu0 %v53_v63  ;;  %1010 = vmatprep.subr.bf16.mxu1 %v1152_v44 }
  0x55   :  { %1026 = vmatprep.mubr.msk.bf16.mxu0 %vm1153_vm0, %v1152_v44  ;;  %1019 = vmatpush3.bf16.msra.mxu0 %v1093_v8 }
  0x56   :  { %1020 = vmatprep.subr.bf16.mxu0 %v1152_v44 }
  0x57   :  { %1011 = vmatpush3.bf16.msra.mxu1 %v1091_v6 }
  0x58   :  { %1012 = vmatprep.subr.bf16.mxu1 %v1152_v44 }
  0x59   :  { %1021 = vmatpush3.bf16.msra.mxu0 %v1094_v9 }
  0x5a   :  { %1022 = vmatprep.subr.bf16.mxu0 %v1152_v44 }
  0x5b   :  { %1013 = vmatpush3.bf16.msra.mxu1 %v1092_v7 }
  0x5d   :  { %1023 = vmatpush3.bf16.msra.mxu0 %v1095_v36 }
  0x5e   :  { %1024 = vmatprep.subr.bf16.mxu0 %v1152_v44  ;;  %v904_v44 = vld [vmem:[%s1310_s6] ss:$0 sm:$0xff]  ;;  %s1123_s6 = scalar_lea.vmem %s836_s5, 64 }
  0x5f   :  { %p1124_p8 = scmp.ne.s32.totalorder %s836_s5, %s1123_s6  ;;  %p1129_p10 = scmp.lt.s32.totalorder %s1123_s6, %s1123_s6 }
  0x61   :  { %1025 = vmatpush3.bf16.msra.mxu0 %v1096_v37  ;;  %p1130_p11 = por %p1129_p10, %p1128_p9 }
  0x63   :  { %p1131_p12 = pnand %p1130_p11, %p1124_p8 }
 0x107   :  { %v926_v10 = vpop.f32.mrb[0].mxu0 }
 0x108   :  { %v927_v12 = vpop.f32.mrb[1].mxu0 }
 0x109   :  { %v928_v13 = vadd.f32 %v927_v12, %v926_v10  ;;  %v929_v14 = vpop.f32.mrb[2].mxu0  ;;  %v948_v15 = vpop.f32.mrb[0].mxu1 }
 0x10a   :  { %v930_v16 = vpop.f32.mrb[3].mxu0  ;;  %v949_v18 = vpop.f32.mrb[1].mxu1 }
 0x10b   :  { %v494_v17 = vadd.f32 %v928_v13, %v844_v11  ;;  %v950_v19 = vadd.f32 %v949_v18, %v948_v15  ;;  %v951_v20 = vpop.f32.mrb[2].mxu1 }
 0x10c   :  { %v952_v21 = vpop.f32.mrb[3].mxu1 }
 0x10d   :  { %v534_v22 = vadd.f32 %v950_v19, %v494_v17 }
 0x111   :  { %v613_v23 = vpop.f32.mrb[4].mxu1 }
 0x112   :  { %v996_v24 = vpop.f32.mrb[5].mxu1 }
 0x113   :  { %v616_v25 = vpop.f32.mrb[6].mxu1 }
 0x114   :  { %v997_v26 = vpop.f32.mrb[7].mxu1 }
 0x127   :  { %v970_v27 = vpop.f32.mrb[4].mxu0 }
 0x128   :  { %v971_v28 = vpop.f32.mrb[5].mxu0 }
 0x129   :  { %v972_v29 = vadd.f32 %v971_v28, %v970_v27  ;;  %v973_v30 = vpop.f32.mrb[6].mxu0 }
 0x12a   :  { %v974_v31 = vpop.f32.mrb[7].mxu0 }
 0x12b   :  { %v574_v32 = vadd.f32 %v972_v29, %v534_v22 }
 0x12d   :  { %v614_v33 = vadd.f32 %v613_v23, %v574_v32 }
 0x12f   :  { %v619_v34 = vmax.f32 %v614_v33, 0.0 }
 0x131   :  { %v620_v35 = vpack.c.bf16 %v619_v34, %v619_v34 }
 0x133   :  { %1015 = vmatmul.mubr.bf16.vlgmr.msra.gmra.mrb[8].mxu1 %v620_v35 }
 0x206   :  { %v726_v39 = vpop.f32.mrb[8].mxu1 }
 0x207   :  { %v727_v40 = vadd.f32 %v895_v38, %v726_v39  ;;  %v1016_v41 = vpop.f32.mrb[9].mxu1 }
 0x208   :  { %v729_v42 = vpop.f32.mrb[10].mxu1 }
 0x209   :  { %v732_v43 = vmax.f32 %v727_v40, 0.0  ;;  %v1017_v45 = vpop.f32.mrb[11].mxu1 }
 0x20b   :  { %v733_v46 = vpack.c.bf16 %v732_v43, %v732_v43 }
 0x20d   :  { %1027 = vmatmul.mubr.msk.bf16.vlgmr.msra.gmra.mrb[8].mxu0 %vm773_vm2, %v733_v46 }
 0x2e0   :  { %v811_v47 = vpop.f32.mrb[8].mxu0 }
 0x2e1   :  { %v812_v48 = vadd.f32 %v904_v44, %v811_v47  ;;  %v1028_v49 = vpop.f32.mrb[9].mxu0 }
 0x2e2   :  { %v814_v50 = vpop.f32.mrb[10].mxu0 }
 0x2e3   :  { %817 = vmax.xlane.f32.xlu0 %v812_v48  ;;  %v1029_v51 = vpop.f32.mrb[11].mxu0 }
 0x370   :  { %v818_v52 = vpop.xlane.xlu0 %817 }
 0x371   :  { %v819_v53 = vsub.f32 %v812_v48, %v818_v52 }
 0x373   :  { %v820_v54 = vmul.f32 1.442695, %v819_v53 }
 0x375   :  { %1097 = vpow2.f32 %v820_v54 }
 0x37f   :  { %v1098_v55 = vpop.eup %1097 }
 0x380   :  { %822 = vadd.xlane.f32.xlu0 %v1098_v55 }
 0x40d   :  { %v823_v56 = vpop.xlane.xlu0 %822 }
 0x40e   :  { %1099 = vlog2.f32 %v823_v56 }
 0x418   :  { %v1100_v57 = vpop.eup %1099 }
 0x419   :  { %v825_v58 = vmul.f32 0.6931472, %v1100_v57 }
 0x41b   :  { %v826_v59 = vsub.f32 %v819_v53, %v825_v58 }
 0x41d   :  { %v827_v60 = vpack.c.bf16 %v826_v59, %v826_v59 }
 0x41f   :  { %828 = vst [vmem:[#allocation5] sm:$0xf] %v827_v60 }
 0x420   :  { %1134 = shalt.err (!%p1131_p12)
}
 0x421   :  { %s1135_s9 = scalar_lea.hbm %s1311_s7, 64 }
 0x422   :  { %p1136_p13 = scmp.ne.s32.totalorder %s1311_s7, %s1135_s9  ;;  %p1139_p0 = scmp.lt.u32.totalorder %s1135_s9, %s1311_s7 }
 0x424   :  { %p1141_p1 = pnand %p1139_p0, %p1136_p13 }
 0x426   :  { %1144 = shalt.err (!%p1141_p1)
}
 0x427   :  { %838 = dma.vmem_to_hbm [thread:$0]  %s836_s5, 64, %s1311_s7, [#allocation4]  }
 0x428   :  { %1147 = dma.done.wait [#allocation4], 64  }
 0x429   :  { %1148 = vsyncadd [#allocation4], 4294967232 }
 0x42a   :  { %842 = vsyncpa [#allocation3], 1 }
 0x42b   :  { %843 = vsyncpa [#allocation4], 1 }

</bundles_post_ra>
